<compile_context>
chip_gen: v6e
topology: v6e:2x2x1
jax: 0.10.0
libtpu: 0.0.40
codegen_flags: <defaults>
</compile_context>

<pallas_src>
import numpy as np
import jax
import jax.numpy as jnp
from jax.experimental import pallas as pl
from jax.experimental.pallas import tpu as pltpu

n_embed_samples = 20
N_QUBIT = 4
N_WIRES = 2 * N_QUBIT          # 8 qubits -> 256 amplitudes
LANES = 128                    # lane-dense output width
_HIGH = jax.lax.Precision.HIGH


# ---------------------------------------------------------------------------
# Static circuit structure: per-register gate tables.
# Each gate = (param_offset, wire_pair_index, is_crot) with wires local to a
# 4-qubit register.  Parameters are read from the runtime vector
#   P = [r0 (12) | r1 (12) | cr (36) | q (36)]          (length 96)
# ---------------------------------------------------------------------------
_PAIRS = [(c, t) for c in range(4) for t in range(4) if c != t]
_PAIR_IDX = {p: i for i, p in enumerate(_PAIRS)}


def _build_gate_tables():
    gA, gB = [], []

    def rot(reg, off, w):            # 1-qubit Rot on local wire w
        reg.append((off, _PAIR_IDX[((w + 1) % 4, w)], 0))

    def crot(reg, off, c, t):        # CRot on local wires (c, t)
        reg.append((off, _PAIR_IDX[(c, t)], 1))

    off_r0 = lambda i: 3 * i
    off_r1 = lambda i: 12 + 3 * i
    off_cr = lambda i, k: 24 + 9 * i + 3 * k
    off_q = lambda a: 60 + a

    # literal transcription of quantum_net (shadowed loop variable included)
    for i in range(4):
        rot(gA, off_r0(i), i)
        rot(gB, off_r0(i), i)
        for i2 in range(4):                      # the shadowed inner "i"
            k = 0
            for j in range(4):
                if i2 == j:
                    continue
                crot(gA, off_cr(i2, k), i2, j)
                crot(gB, off_cr(i2, k), i2, j)
                k += 1
    for i in range(4):
        rot(gA, off_r1(i), i)
        rot(gB, off_r1(i), i)
    for i in range(4):
        rot(gB, off_r0(i), i)
    for i in range(4):
        k = 0
        for j in range(4):
            if i == j:
                continue
            crot(gB, off_cr(i, k), i, j)
            k += 1
    for i in range(4):
        rot(gB, off_r1(i), i)
    for i in range(3):
        rot(gA, off_q(3 * i), i + 1)
        rot(gB, off_q(3 * i), i + 1)
    ctr = 0
    for i in range(3):
        for j in range(3):
            if i == j:
                continue
            crot(gA, off_q(9 + 3 * ctr), i + 1, j + 1)
            crot(gB, off_q(9 + 3 * ctr), i + 1, j + 1)
            ctr += 1
    for i in range(3):
        rot(gA, off_q(27 + 3 * i), i + 1)
        rot(gB, off_q(27 + 3 * i), i + 1)
    for i in range(3):
        rot(gB, off_q(3 * i), i + 1)
    ctr = 0
    for i in range(3):
        for j in range(3):
            if i == j:
                continue
            crot(gB, off_q(9 + 3 * ctr), i + 1, j + 1)
            ctr += 1
    for i in range(3):
        rot(gB, off_q(27 + 3 * i), i + 1)
    return gA, gB


_GATES_A, _GATES_B = _build_gate_tables()
N_GATES_A, N_GATES_B = len(_GATES_A), len(_GATES_B)      # 68, 100
assert N_GATES_A <= N_GATES_B
_ALL_GATES = _GATES_A + _GATES_B
N_GATES = len(_ALL_GATES)                                # 168
_GATE_OFF = np.array([g[0] for g in _ALL_GATES], np.int32)
_GATE_PAIR = np.array([g[1] for g in _ALL_GATES], np.int32)
_GATE_CROT = np.array([g[2] for g in _ALL_GATES], bool)

_PAIR_ONEHOT = np.zeros((N_GATES, len(_PAIRS)), np.float32)
_PAIR_ONEHOT[np.arange(N_GATES), _GATE_PAIR] = 1.0


def _build_selection_basis():
    """Static 0/+-1 basis B (12*32, 32*32) such that for gate k with pair p_k

        T_k = ((one-hot over pairs) * V_k)  @  B     (reshaped to 32x32)

    where V_k = [U4 real, row-major (16) | U4 imag, row-major (16)] and
    T_k = R(U16_k)^T = [[Ur^T, Ui^T], [-Ui^T, Ur^T]] is the TRANSPOSED
    block-real form of the 16x16 embedded gate (wire 0 = MSB, control = MSB
    of the local 2-bit index)."""
    bits = [[(x >> (3 - w)) & 1 for w in range(4)] for x in range(16)]
    B = np.zeros((len(_PAIRS), 32, 32 * 32), np.float32)
    for p, (c, t) in enumerate(_PAIRS):
        for a in range(32):
            a0 = a % 16
            for b in range(32):
                b0 = b % 16
                if any(bits[a0][w] != bits[b0][w]
                       for w in range(4) if w not in (c, t)):
                    continue
                ia = 2 * bits[a0][c] + bits[a0][t]
                ib = 2 * bits[b0][c] + bits[b0][t]
                real_part = (a < 16) == (b < 16)
                v = (0 if real_part else 16) + 4 * ib + ia
                sign = -1.0 if (a >= 16 and b < 16) else 1.0
                B[p, v, a * 32 + b] = sign
    return B.reshape(len(_PAIRS) * 32, 32 * 32)


def _build_selectors():
    """(2, 32, 128) selectors.  p = y*y with y = [Re(U s) | Im(U s)] (32,);
    probs[m] = p[m] + p[8+m] + p[16+m] + p[24+m].  Register A -> cols 0..7,
    register B -> cols 8..15; cols 16..127 are zero lane padding so the
    output store is a single lane-dense (1,128) slab."""
    S = np.zeros((2, 32, LANES), np.float32)
    for m in range(8):
        for blk in range(4):
            S[0, blk * 8 + m, m] = 1.0
            S[1, blk * 8 + m, 8 + m] = 1.0
    return S


# ---------------------------------------------------------------------------
# Pallas kernel 1: collapsed pre-net  (single affine map 256 -> 36, padded
# to 128 lanes; no activation is ever applied in the torch forward).
# ---------------------------------------------------------------------------
def _prenet_kernel(x_ref, w_ref, b_ref, o_ref):
    o_ref[...] = (jnp.dot(x_ref[...], w_ref[...],
                          preferred_element_type=jnp.float32) + b_ref[...])


def prenet_forward(x, prenet_params):
    """x: (256,) f32 -> (36,) f32; one grid-less Pallas call, (1,128) output."""
    w_eff, b_eff = prenet_params
    out = pl.pallas_call(
        _prenet_kernel,
        out_shape=jax.ShapeDtypeStruct((1, LANES), jnp.float32),
        in_specs=[pl.BlockSpec(memory_space=pltpu.MemorySpace.VMEM)] * 3,
        out_specs=pl.BlockSpec(memory_space=pltpu.MemorySpace.VMEM),
        cost_estimate=pl.CostEstimate(
            flops=2 * 256 * LANES, transcendentals=0,
            bytes_accessed=4 * (256 + 256 * LANES + 2 * LANES)),
    )(x[None, :], w_eff, b_eff)
    return out[0, :36]


# ---------------------------------------------------------------------------
# Pallas kernel 2: finish the composition tree (last level), apply the two
# register unitaries (block-real, transposed) to the state, square and
# marginalize onto [probs(1,2,3), probs(5,6,7)] with lane-dense selectors.
# ---------------------------------------------------------------------------
def _measure_kernel(x_ref, t_ref, sel_ref, o_ref):
    # t_ref: (4,32,32) = [A_first_half, A_second_half, B_first_half, B_second_half]
    wa = jnp.dot(t_ref[0], t_ref[1], preferred_element_type=jnp.float32)  # R(U_A)^T
    wb = jnp.dot(t_ref[2], t_ref[3], preferred_element_type=jnp.float32)  # R(U_B)^T
    x = x_ref[...]                                                        # (1,32)
    ya = jnp.dot(x, wa, preferred_element_type=jnp.float32)               # [Re|Im](A s)
    yb = jnp.dot(x, wb, preferred_element_type=jnp.float32)               # [Re|Im](B s)
    pa = ya * ya
    pb = yb * yb
    o_ref[...] = (jnp.dot(pa, sel_ref[0], preferred_element_type=jnp.float32)
                  + jnp.dot(pb, sel_ref[1], preferred_element_type=jnp.float32))


def measure_forward(s_norm, T2, selectors):
    """s_norm: (16,) complex64 unit-norm register state; T2: (2,2,32,32) f32
    half-products of the transposed block-real register unitaries.
    Returns (16,) = [probs(1,2,3), probs(5,6,7)]."""
    x = jnp.concatenate([jnp.real(s_norm), jnp.imag(s_norm)])[None, :].astype(jnp.float32)
    t4 = T2.reshape(4, 32, 32)
    out = pl.pallas_call(
        _measure_kernel,
        out_shape=jax.ShapeDtypeStruct((1, LANES), jnp.float32),
        in_specs=[pl.BlockSpec(memory_space=pltpu.MemorySpace.VMEM)] * 3,
        out_specs=pl.BlockSpec(memory_space=pltpu.MemorySpace.VMEM),
        cost_estimate=pl.CostEstimate(
            flops=2 * (2 * 32 ** 3 + 2 * 32 * 32 + 2 * 32 * LANES) + 64,
            transcendentals=0,
            bytes_accessed=4 * (32 + 4 * 32 * 32 + 2 * 32 * LANES + LANES)),
    )(x, t4, selectors)
    return out[0, :16]


# ---------------------------------------------------------------------------
# Gate construction (real, gather-free) + identity-lean composition tree.
# ---------------------------------------------------------------------------
def compose_register_blockreal(q, ind, params):
    """Returns T (2, 2, 32, 32) f32 with T[r,0] @ T[r,1] = R(U_r)^T, the
    transposed block-real form of register r's composed 16x16 unitary
    (r=0: wires 0..3, r=1: wires 4..7)."""
    mp_rot, mp_crot = params["mp_rot"], params["mp_crot"]
    P = jnp.concatenate([mp_rot[ind, 0].reshape(-1),
                         mp_rot[ind, 1].reshape(-1),
                         mp_crot[ind].reshape(-1),
                         q]).astype(jnp.float32)                              # (96,)
    g = P[jnp.asarray(_GATE_OFF)[:, None] + jnp.arange(3)[None, :]]          # (168,3)
    phi, theta, omega = g[:, 0], g[:, 1], g[:, 2]
    c, s = jnp.cos(0.5 * theta), jnp.sin(0.5 * theta)
    ca, sa = jnp.cos(0.5 * (phi + omega)), jnp.sin(0.5 * (phi + omega))
    cb, sb = jnp.cos(0.5 * (phi - omega)), jnp.sin(0.5 * (phi - omega))
    # Rot matrix entries, real/imag (r00=ea*c, r01=-eb*s, r10=conj(eb)*s, r11=conj(ea)*c)
    r00r, r00i = c * ca, -c * sa
    r01r, r01i = -s * cb, -s * sb
    r10r, r10i = s * cb, -s * sb
    r11r, r11i = c * ca, c * sa
    is_cr = jnp.asarray(_GATE_CROT)
    one, zero = jnp.ones_like(r00r), jnp.zeros_like(r00r)
    # 4x4 local gate: top-left block = I (CRot) or R (Rot), bottom-right = R.
    tl00r = jnp.where(is_cr, one, r00r)
    tl00i = jnp.where(is_cr, zero, r00i)
    tl01r = jnp.where(is_cr, zero, r01r)
    tl01i = jnp.where(is_cr, zero, r01i)
    tl10r = jnp.where(is_cr, zero, r10r)
    tl10i = jnp.where(is_cr, zero, r10i)
    tl11r = jnp.where(is_cr, one, r11r)
    tl11i = jnp.where(is_cr, zero, r11i)
    # V[k] = [U4 real row-major (16) | U4 imag row-major (16)]
    V = jnp.stack([tl00r, tl01r, zero, zero, tl10r, tl11r, zero, zero,
                   zero, zero, r00r, r01r, zero, zero, r10r, r11r,
                   tl00i, tl01i, zero, zero, tl10i, tl11i, zero, zero,
                   zero, zero, r00i, r01i, zero, zero, r10i, r11i], axis=1)   # (168,32)
    VP = (V[:, None, :] * params["pair_onehot"][:, :, None]).reshape(N_GATES, -1)  # (168,384)
    Tg = jnp.dot(VP, params["basis"], precision=_HIGH).reshape(N_GATES, 32, 32)    # (168,32,32)

    # Pad register A (68 gates) with identities up to register B's 100 so both
    # registers share one batched composition tree (no pad-to-128 waste).
    eye_pad = jnp.broadcast_to(jnp.eye(32, dtype=jnp.float32),
                               (N_GATES_B - N_GATES_A, 32, 32))
    TA = jnp.concatenate([Tg[:N_GATES_A], eye_pad], axis=0)
    T = jnp.stack([TA, Tg[N_GATES_A:]], axis=0)                               # (2,100,32,32)

    # Transposed matrices compose earlier-on-the-left:
    #   R(U_N ... U_1)^T = T_1 T_2 ... T_N.  Tree: 100->50->25->13->7->4->2;
    # the final (2 -> 1) level is done inside the measurement kernel.
    while T.shape[1] > 2:
        n = T.shape[1]
        h = n // 2
        prod = jnp.einsum('rkab,rkbc->rkac',
                          T[:, 0:2 * h:2], T[:, 1:2 * h:2], precision=_HIGH)
        if n % 2:
            prod = jnp.concatenate([prod, T[:, 2 * h:]], axis=1)
        T = prod
    return T                                                                  # (2,2,32,32)


# ---------------------------------------------------------------------------
# Full DressedQuantumNet.forward
# ---------------------------------------------------------------------------
def dressed_quantum_net_forward(input_features, ind, params):
    q = prenet_forward(input_features, params["prenet"])                      # (36,)
    # (original code calls print(pre_out) here -- side effect omitted)
    T2 = compose_register_blockreal(q, ind, params)
    s = params["input_states"][ind]                                           # (16,) c64
    s = s / jnp.sqrt(jnp.sum(jnp.real(s) ** 2 + jnp.imag(s) ** 2))  # AmplitudeEmbedding(normalize=True)
    probs16 = measure_forward(s, T2, params["selectors"])                     # (16,)
    return probs16.reshape(1, 2, 8).astype(jnp.float32)                       # .float().unsqueeze(0)


# ---------------------------------------------------------------------------
# float64 NumPy reference (literal gate-by-gate statevector sim), used only
# for the correctness check in __main__.
# ---------------------------------------------------------------------------
def _np_rot(p):
    phi, theta, omega = float(p[0]), float(p[1]), float(p[2])
    c, s = np.cos(theta / 2), np.sin(theta / 2)
    ea, eb = np.exp(-0.5j * (phi + omega)), np.exp(0.5j * (phi - omega))
    return np.array([[ea * c, -eb * s], [np.conj(eb) * s, np.conj(ea) * c]],
                    dtype=np.complex128)


def _np_crot(p):
    U = np.eye(4, dtype=np.complex128)
    U[2:, 2:] = _np_rot(p)
    return U


def _np_apply_1q(psi, U, w):
    psi = np.tensordot(U, psi, axes=[[1], [w]])
    return np.moveaxis(psi, 0, w)


def _np_apply_2q(psi, U4, c, t):
    Ur = U4.reshape(2, 2, 2, 2)
    psi = np.tensordot(Ur, psi, axes=[[2, 3], [c, t]])
    return np.moveaxis(psi, [0, 1], [c, t])


def _build_marginal_matrix():
    M = np.zeros((2 ** N_WIRES, 16), np.float64)
    for k in range(2 ** N_WIRES):
        bits = [(k >> (N_WIRES - 1 - w)) & 1 for w in range(N_WIRES)]
        M[k, 4 * bits[1] + 2 * bits[2] + bits[3]] = 1.0
        M[k, 8 + 4 * bits[5] + 2 * bits[6] + bits[7]] = 1.0
    return M


def reference_probs_np(q, ind, input_states, mp_rot, mp_crot):
    q = np.asarray(q, np.float64)
    state = np.asarray(input_states, np.complex128)[ind]
    inp = np.kron(state, state)
    inp = inp / np.linalg.norm(inp)
    psi = inp.reshape((2,) * N_WIRES)
    r0 = np.asarray(mp_rot, np.float64)[ind, 0]
    r1 = np.asarray(mp_rot, np.float64)[ind, 1]
    cr = np.asarray(mp_crot, np.float64)[ind]

    def R(ps, p, w):
        return _np_apply_1q(ps, _np_rot(p), w)

    def CR(ps, p, c, t):
        return _np_apply_2q(ps, _np_crot(p), c, t)

    for i in range(0, 4):
        psi = R(psi, r0[i], i)
        psi = R(psi, r0[i], i + 4)
        for i in range(4):                       # shadowing kept on purpose
            index = 0
            for j in range(4):
                if i == j:
                    continue
                psi = CR(psi, cr[i, index], i, j)
                psi = CR(psi, cr[i, index], i + 4, j + 4)
                index += 1
    for i in range(0, 4):
        psi = R(psi, r1[i], i)
        psi = R(psi, r1[i], i + 4)
    for i in range(0, 4):
        psi = R(psi, r0[i], i + 4)
    for i in range(4):
        index = 0
        for j in range(4):
            if i == j:
                continue
            psi = CR(psi, cr[i, index], i + 4, j + 4)
            index += 1
    for i in range(0, 4):
        psi = R(psi, r1[i], i + 4)
    for i in range(0, 3):
        psi = R(psi, q[3 * i:3 * i + 3], i + 1)
        psi = R(psi, q[3 * i:3 * i + 3], i + 1 + 4)
    ctr = 0
    for i in range(3):
        for j in range(3):
            if i == j:
                continue
            psi = CR(psi, q[9 + ctr * 3:12 + ctr * 3], i + 1, j + 1)
            psi = CR(psi, q[9 + ctr * 3:12 + ctr * 3], i + 1 + 4, j + 1 + 4)
            ctr += 1
    for i in range(0, 3):
        psi = R(psi, q[27 + 3 * i:30 + 3 * i], i + 1)
        psi = R(psi, q[27 + 3 * i:30 + 3 * i], i + 1 + 4)
    for i in range(0, 3):
        psi = R(psi, q[3 * i:3 * i + 3], i + 1 + 4)
    ctr = 0
    for i in range(3):
        for j in range(3):
            if i == j:
                continue
            psi = CR(psi, q[9 + ctr * 3:12 + ctr * 3], i + 1 + 4, j + 1 + 4)
            ctr += 1
    for i in range(0, 3):
        psi = R(psi, q[27 + 3 * i:30 + 3 * i], i + 1 + 4)
    probs = np.abs(psi.reshape(-1)) ** 2
    return probs @ _build_marginal_matrix()


if __name__ == "__main__":
    key = jax.random.PRNGKey(0)
    ks = jax.random.split(key, 12)

    def linear_init(kw, kb, out_f, in_f):
        bound = 1.0 / np.sqrt(in_f)
        w = jax.random.uniform(kw, (out_f, in_f), jnp.float32, -bound, bound)
        b = jax.random.uniform(kb, (out_f,), jnp.float32, -bound, bound)
        return w, b

    w1, b1 = linear_init(ks[0], ks[1], 128, 256)
    w2, b2 = linear_init(ks[2], ks[3], 64, 128)
    w3, b3 = linear_init(ks[4], ks[5], 36, 64)

    n_states = n_embed_samples * 4
    # TODO(synk): the original globals (input_states = zeros, model_params = [])
    # make the qnode unrunnable as written; deterministic synthetic values are
    # supplied instead and the circuit itself is reproduced exactly.
    input_states = (jax.random.normal(ks[6], (n_states, 16), jnp.float32)
                    + 1j * jax.random.normal(ks[7], (n_states, 16), jnp.float32)
                    ).astype(jnp.complex64)
    mp_rot = jax.random.uniform(ks[8], (n_states, 2, 4, 3), jnp.float32, 0.0, 2 * np.pi)
    mp_crot = jax.random.uniform(ks[9], (n_states, 4, 3, 3), jnp.float32, 0.0, 2 * np.pi)

    # Collapse the (activation-free) pre-net to one precomposed affine map,
    # done ONCE in float64, lane-padded to 128 columns.
    w1n, w2n, w3n = (np.asarray(w, np.float64) for w in (w1, w2, w3))
    b1n, b2n, b3n = (np.asarray(b, np.float64) for b in (b1, b2, b3))
    W_eff = w1n.T @ w2n.T @ w3n.T                         # (256, 36)
    b_eff = b1n @ w2n.T @ w3n.T + b2n @ w3n.T + b3n       # (36,)
    w_eff_pad = np.zeros((256, LANES), np.float32)
    w_eff_pad[:, :36] = W_eff.astype(np.float32)
    b_eff_pad = np.zeros((1, LANES), np.float32)
    b_eff_pad[0, :36] = b_eff.astype(np.float32)
    prenet_params = (jnp.asarray(w_eff_pad), jnp.asarray(b_eff_pad))

    params = {
        "prenet": prenet_params,
        "input_states": input_states,
        "mp_rot": mp_rot,
        "mp_crot": mp_crot,
        "basis": jnp.asarray(_build_selection_basis()),      # (384, 1024) 0/+-1
        "pair_onehot": jnp.asarray(_PAIR_ONEHOT),             # (168, 12)
        "selectors": jnp.asarray(_build_selectors()),          # (2, 32, 128)
    }

    input_features = jax.random.normal(ks[10], (256,), jnp.float32)
    ind = jnp.int32(3)

    fwd = jax.jit(dressed_quantum_net_forward)
    out = jax.block_until_ready(fwd(input_features, ind, params))

    assert out.shape == (1, 2, 8) and out.dtype == jnp.float32
    # sanity: each probability vector sums to ~1
    sums = np.asarray(jnp.sum(out, axis=-1))[0]
    assert np.allclose(sums, 1.0, atol=1e-3), sums

    # correctness: compare against a float64 literal gate-by-gate reference
    q_kernel = np.asarray(jax.jit(prenet_forward)(input_features, prenet_params))
    q_ref = (((np.asarray(input_features, np.float64) @ w1n.T + b1n) @ w2n.T + b2n)
             @ w3n.T + b3n)
    np.testing.assert_allclose(q_kernel, q_ref, rtol=2e-2, atol=2e-2)

    probs_ref = reference_probs_np(q_kernel, int(ind),
                                   np.asarray(input_states),
                                   np.asarray(mp_rot), np.asarray(mp_crot))
    np.testing.assert_allclose(np.asarray(out).reshape(16), probs_ref, atol=5e-3)

    print("KERNEL_OK")
</pallas_src>

<mosaic_0001>
module attributes {stable_mosaic.version = 11 : i64} {
  func.func @_prenet_kernel(%arg0: memref<1x256xf32, #tpu.memory_space<vmem>>, %arg1: memref<256x128xf32, #tpu.memory_space<vmem>>, %arg2: memref<1x128xf32, #tpu.memory_space<vmem>>, %arg3: memref<1x128xf32, #tpu.memory_space<vmem>>) attributes {dimension_semantics = [], scalar_prefetch = 0 : i64, scratch_operands = 0 : i64, tpu.core_type = #tpu.core_type<tc>} {
    %c0 = arith.constant 0 : index
    %c0_0 = arith.constant 0 : index
    %0 = vector.load %arg0[%c0, %c0_0] : memref<1x256xf32, #tpu.memory_space<vmem>>, vector<1x256xf32>
    %c0_1 = arith.constant 0 : index
    %c0_2 = arith.constant 0 : index
    %1 = vector.load %arg1[%c0_1, %c0_2] : memref<256x128xf32, #tpu.memory_space<vmem>>, vector<256x128xf32>
    %cst = arith.constant dense<0.000000e+00> : vector<1x128xf32>
    %2 = tpu.matmul %0, %1, %cst {dimension_numbers = #tpu.dot_dimension_numbers<[1], [0], [0], [1], [0, 0, 1, 1], [], []>} : vector<1x256xf32>, vector<256x128xf32>, vector<1x128xf32> -> vector<1x128xf32>
    %c0_3 = arith.constant 0 : index
    %c0_4 = arith.constant 0 : index
    %3 = vector.load %arg2[%c0_3, %c0_4] : memref<1x128xf32, #tpu.memory_space<vmem>>, vector<1x128xf32>
    %4 = arith.addf %2, %3 : vector<1x128xf32>
    %c0_5 = arith.constant 0 : index
    %c0_6 = arith.constant 0 : index
    %5 = vector.load %arg3[%c0_5, %c0_6] : memref<1x128xf32, #tpu.memory_space<vmem>>, vector<1x128xf32>
    tpu.vector_store %arg3[%c0_5, %c0_6], %4 {strides = array<i32>} : memref<1x128xf32, #tpu.memory_space<vmem>>, vector<1x128xf32>,
    return
  }
}

module attributes {stable_mosaic.version = 11 : i64} {
  func.func @_measure_kernel(%arg0: memref<1x32xf32, #tpu.memory_space<vmem>>, %arg1: memref<4x32x32xf32, #tpu.memory_space<vmem>>, %arg2: memref<2x32x128xf32, #tpu.memory_space<vmem>>, %arg3: memref<1x128xf32, #tpu.memory_space<vmem>>) attributes {dimension_semantics = [], scalar_prefetch = 0 : i64, scratch_operands = 0 : i64, tpu.core_type = #tpu.core_type<tc>} {
    %c0 = arith.constant 0 : index
    %c0_0 = arith.constant 0 : index
    %c0_1 = arith.constant 0 : index
    %0 = vector.load %arg1[%c0, %c0_0, %c0_1] : memref<4x32x32xf32, #tpu.memory_space<vmem>>, vector<1x32x32xf32>
    %1 = vector.shape_cast %0 : vector<1x32x32xf32> to vector<32x32xf32>
    %c1 = arith.constant 1 : index
    %c0_2 = arith.constant 0 : index
    %c0_3 = arith.constant 0 : index
    %2 = vector.load %arg1[%c1, %c0_2, %c0_3] : memref<4x32x32xf32, #tpu.memory_space<vmem>>, vector<1x32x32xf32>
    %3 = vector.shape_cast %2 : vector<1x32x32xf32> to vector<32x32xf32>
    %cst = arith.constant dense<0.000000e+00> : vector<32x32xf32>
    %4 = tpu.matmul %1, %3, %cst {dimension_numbers = #tpu.dot_dimension_numbers<[1], [0], [0], [1], [0, 0, 1, 1], [], []>} : vector<32x32xf32>, vector<32x32xf32>, vector<32x32xf32> -> vector<32x32xf32>
    %c2 = arith.constant 2 : index
    %c0_4 = arith.constant 0 : index
    %c0_5 = arith.constant 0 : index
    %5 = vector.load %arg1[%c2, %c0_4, %c0_5] : memref<4x32x32xf32, #tpu.memory_space<vmem>>, vector<1x32x32xf32>
    %6 = vector.shape_cast %5 : vector<1x32x32xf32> to vector<32x32xf32>
    %c3 = arith.constant 3 : index
    %c0_6 = arith.constant 0 : index
    %c0_7 = arith.constant 0 : index
    %7 = vector.load %arg1[%c3, %c0_6, %c0_7] : memref<4x32x32xf32, #tpu.memory_space<vmem>>, vector<1x32x32xf32>
    %8 = vector.shape_cast %7 : vector<1x32x32xf32> to vector<32x32xf32>
    %cst_8 = arith.constant dense<0.000000e+00> : vector<32x32xf32>
    %9 = tpu.matmul %6, %8, %cst_8 {dimension_numbers = #tpu.dot_dimension_numbers<[1], [0], [0], [1], [0, 0, 1, 1], [], []>} : vector<32x32xf32>, vector<32x32xf32>, vector<32x32xf32> -> vector<32x32xf32>
    %c0_9 = arith.constant 0 : index
    %c0_10 = arith.constant 0 : index
    %10 = vector.load %arg0[%c0_9, %c0_10] : memref<1x32xf32, #tpu.memory_space<vmem>>, vector<1x32xf32>
    %cst_11 = arith.constant dense<0.000000e+00> : vector<1x32xf32>
    %11 = tpu.matmul %10, %4, %cst_11 {dimension_numbers = #tpu.dot_dimension_numbers<[1], [0], [0], [1], [0, 0, 1, 1], [], []>} : vector<1x32xf32>, vector<32x32xf32>, vector<1x32xf32> -> vector<1x32xf32>
    %cst_12 = arith.constant dense<0.000000e+00> : vector<1x32xf32>
    %12 = tpu.matmul %10, %9, %cst_12 {dimension_numbers = #tpu.dot_dimension_numbers<[1], [0], [0], [1], [0, 0, 1, 1], [], []>} : vector<1x32xf32>, vector<32x32xf32>, vector<1x32xf32> -> vector<1x32xf32>
    %13 = arith.mulf %11, %11 : vector<1x32xf32>
    %14 = arith.mulf %12, %12 : vector<1x32xf32>
    %c0_13 = arith.constant 0 : index
    %c0_14 = arith.constant 0 : index
    %c0_15 = arith.constant 0 : index
    %15 = vector.load %arg2[%c0_13, %c0_14, %c0_15] : memref<2x32x128xf32, #tpu.memory_space<vmem>>, vector<1x32x128xf32>
    %16 = vector.shape_cast %15 : vector<1x32x128xf32> to vector<32x128xf32>
    %cst_16 = arith.constant dense<0.000000e+00> : vector<1x128xf32>
    %17 = tpu.matmul %13, %16, %cst_16 {dimension_numbers = #tpu.dot_dimension_numbers<[1], [0], [0], [1], [0, 0, 1, 1], [], []>} : vector<1x32xf32>, vector<32x128xf32>, vector<1x128xf32> -> vector<1x128xf32>
    %c1_17 = arith.constant 1 : index
    %c0_18 = arith.constant 0 : index
    %c0_19 = arith.constant 0 : index
    %18 = vector.load %arg2[%c1_17, %c0_18, %c0_19] : memref<2x32x128xf32, #tpu.memory_space<vmem>>, vector<1x32x128xf32>
    %19 = vector.shape_cast %18 : vector<1x32x128xf32> to vector<32x128xf32>
    %cst_20 = arith.constant dense<0.000000e+00> : vector<1x128xf32>
    %20 = tpu.matmul %14, %19, %cst_20 {dimension_numbers = #tpu.dot_dimension_numbers<[1], [0], [0], [1], [0, 0, 1, 1], [], []>} : vector<1x32xf32>, vector<32x128xf32>, vector<1x128xf32> -> vector<1x128xf32>
    %21 = arith.addf %17, %20 : vector<1x128xf32>
    %c0_21 = arith.constant 0 : index
    %c0_22 = arith.constant 0 : index
    %22 = vector.load %arg3[%c0_21, %c0_22] : memref<1x128xf32, #tpu.memory_space<vmem>>, vector<1x128xf32>
    tpu.vector_store %arg3[%c0_21, %c0_22], %21 {strides = array<i32>} : memref<1x128xf32, #tpu.memory_space<vmem>>, vector<1x128xf32>,
    return
  }
}

</mosaic_0001>

<bundles_post_ra>
// kernel: custom-call.1
= control target key start
LH: loop header
LB: loop body
LE: loop exit
PB: predicated region body
PF: predicated region fallthrough
CT: control target
= control target key end

     0   :  { %s51_s0 = inlined_call_operand.hbm [shape: c64[80,16], index: 0, kind: input, shape index: {}]   ;;  %s52_s1 = inlined_call_operand.vmem [shape: f32[80,16], index: 1, kind: output, shape index: {}]  }
   0x1   :  { %s2_s8 = scalar_lea.hbm %s51_s0, 256 }
   0x2   :  { %3 = vsyncpa [#allocation0], 0  ;;  %s4_s11 = sshll.u32 %s52_s1, 4  ;;  %s5_s11 = int_to_ptr.vmem [resolvable:$true] %s4_s11 }
   0x3   :  { %s20_s12 = scalar_lea.vmem %s5_s11, 256  ;;  %p25_p1 = scmp.lt.s32.totalorder %s5_s11, %s5_s11 }
   0x4   :  { %p21_p0 = scmp.ne.s32.totalorder %s5_s11, %s20_s12  ;;  %p26_p2 = scmp.lt.s32.totalorder %s20_s12, %s20_s12 }
   0x6   :  { %p27_p3 = por %p26_p2, %p25_p1 }
   0x8   :  { %p28_p4 = pnand %p27_p3, %p21_p0 }
   0xa   :  { %31 = shalt.err (!%p28_p4)  }
   0xb   :  { %7 = dma.hbm_to_vmem [thread:$0]  %s2_s8, 256, %s5_s11, [#allocation0] }
   0xc   :  { %33 = dma.done.wait [#allocation0], 256  }
   0xd   :  { %34 = vsyncadd [#allocation0], 4294967040 }
   0xe   :  { %9 = vsyncpa [#allocation0], 1 }

// kernel: custom-call
= control target key start
LH: loop header
LB: loop body
LE: loop exit
PB: predicated region body
PF: predicated region fallthrough
CT: control target
= control target key end

     0   :  { %2 = vsyncpa [#allocation0], 0  ;;  %s47_s0 = inlined_call_operand.hbm [shape: c64[80,16], index: 0, kind: input, shape index: {}]   ;;  %s48_s1 = inlined_call_operand.vmem [shape: f32[80,16], index: 1, kind: output, shape index: {}]  }
   0x1   :  { %s3_s8 = sshll.u32 %s48_s1, 4  ;;  %s4_s8 = int_to_ptr.vmem [resolvable:$true] %s3_s8 }
   0x2   :  { %s17_s9 = scalar_lea.vmem %s4_s8, 256  ;;  %p22_p1 = scmp.lt.s32.totalorder %s4_s8, %s4_s8 }
   0x3   :  { %p18_p0 = scmp.ne.s32.totalorder %s4_s8, %s17_s9  ;;  %p23_p2 = scmp.lt.s32.totalorder %s17_s9, %s17_s9 }
   0x5   :  { %p24_p3 = por %p23_p2, %p22_p1 }
   0x7   :  { %p25_p4 = pnand %p24_p3, %p18_p0 }
   0x9   :  { %28 = shalt.err (!%p25_p4)  }
   0xa   :  { %6 = dma.hbm_to_vmem [thread:$0]  %s47_s0, 256, %s4_s8, [#allocation0] }
   0xb   :  { %29 = dma.done.wait [#allocation0], 256  }
   0xc   :  { %30 = vsyncadd [#allocation0], 4294967040 }
   0xd   :  { %8 = vsyncpa [#allocation0], 1 }

// kernel: squeeze.10
= control target key start
LH: loop header
LB: loop body
LE: loop exit
PB: predicated region body
PF: predicated region fallthrough
CT: control target
= control target key end

     0   :  { %vm8_vm0 = vcmask 23552   ;;  %s40_s8 = smov 3   ;;  %s41_s9 = smov 6   ;;  %vm14_vm1 = vcmask 97352   ;;  %vm20_vm2 = vcmask 72752   ;;  %vm26_vm3 = vcmask 48152   ;;  %s58_s0 = inlined_call_operand.vmem [shape: f32[1,1,4,3], index: 0, kind: input, shape index: {}]   ;;  %s59_s1 = inlined_call_operand.vmem [shape: f32[12], index: 1, kind: output, shape index: {}]  }
   0x1   :  { %v5_v0 = vld [vmem:[%s58_s0] sm:$0xf]  ;;  %s39_s0 = smov 9  }
   0x2   :  { %6 = vst [vmem:[#allocation1] sm:$0xf] %v5_v0 }
   0x9   :  { %v11_v1 = vld [vmem:[#allocation1 + $0x3] sm:$0x1]   ;;  %v23_v2 = vld [vmem:[#allocation1 + $0x1] sm:$0x1]   ;;  %v7_v3 = vld [vmem:[#allocation1] sm:$0x1]  }
   0xa   :  { %12 = vrot.lane.b32.xlu0 %v11_v1, %s39_s0  ;;  %24 = vrot.lane.b32.xlu1 %v23_v2, %s40_s8  ;;  %v17_v4 = vld [vmem:[#allocation1 + $0x2] sm:$0x1]   ;;  %9 = vst.msk [vmem:[#allocation0] sm:$0x1] %vm8_vm0, %v7_v3  }
   0xe   :  { %18 = vrot.lane.b32.xlu0 %v17_v4, %s41_s9 }
  0x7c   :  { %v13_v5 = vpop.permute.xlu0 %12   ;;  %v25_v6 = vpop.permute.xlu1 %24  }
  0x7d   :  { %15 = vst.msk [vmem:[#allocation0] sm:$0x1] %vm14_vm1, %v13_v5  }
  0x80   :  { %v19_v7 = vpop.permute.xlu0 %18  }
  0x81   :  { %21 = vst.msk [vmem:[#allocation0] sm:$0x1] %vm20_vm2, %v19_v7  }
  0x82   :  { %27 = vst.msk [vmem:[#allocation0] sm:$0x1] %vm26_vm3, %v25_v6  }
  0x89   :  { %v32_v8 = vld [vmem:[#allocation0] sm:$0x1] }
  0x8a   :  { %35 = vst [vmem:[%s59_s1] sm:$0x1] %v32_v8 }

// kernel: squeeze.12
= control target key start
LH: loop header
LB: loop body
LE: loop exit
PB: predicated region body
PF: predicated region fallthrough
CT: control target
= control target key end

     0   :  { %s115_s14 = smov 27   ;;  %vm22_vm0 = vcmask 23552   ;;  %s116_s15 = smov 30   ;;  %vm28_vm1 = vcmask 294152   ;;  %vm34_vm2 = vcmask 269552   ;;  %vm40_vm3 = vcmask 244952   ;;  %s150_s0 = inlined_call_operand.vmem [shape: f32[1,4,3,3], index: 0, kind: input, shape index: {}]   ;;  %s151_s1 = inlined_call_operand.vmem [shape: f32[36], index: 1, kind: output, shape index: {}]  }
   0x1   :  { %v100_v0 = vld [vmem:[%s150_s0 + $0xc] sm:$0xf]  ;;  %v101_v1 = vld [vmem:[%s150_s0 + $0x8] sm:$0xf]  ;;  %v102_v2 = vld [vmem:[%s150_s0 + $0x4] sm:$0xf] }
   0x2   :  { %9 = vst [vmem:[#allocation1 + $0x18] sm:$0xf] %v100_v0  ;;  %14 = vst [vmem:[#allocation1 + $0x10] sm:$0xf] %v101_v1  ;;  %v19_v3 = vld [vmem:[%s150_s0] sm:$0xf] }
   0x3   :  { %18 = vst [vmem:[#allocation1 + $0x8] sm:$0xf] %v102_v2  ;;  %20 = vst [vmem:[#allocation1] sm:$0xf] %v19_v3  ;;  %s114_s0 = smov 33   ;;  %s117_s16 = smov 24  }
   0x4   :  { %s118_s17 = smov 21   ;;  %s119_s18 = smov 18   ;;  %vm46_vm4 = vcmask 220352   ;;  %vm52_vm5 = vcmask 195752   ;;  %vm58_vm6 = vcmask 171152   ;;  %vm64_vm7 = vcmask 146552  }
   0x5   :  { %s120_s19 = smov 15   ;;  %s121_s20 = smov 12   ;;  %vm70_vm8 = vcmask 121952   ;;  %vm76_vm9 = vcmask 97352   ;;  %vm82_vm10 = vcmask 72752   ;;  %vm88_vm11 = vcmask 48152  }
   0x6   :  { %s122_s21 = smov 9   ;;  %s123_s22 = smov 6  }
   0x7   :  { %s124_s23 = smov 3  }
   0x9   :  { %v25_v4 = vld [vmem:[#allocation1 + $0x1a] sm:$0x1]   ;;  %v37_v5 = vld [vmem:[#allocation1 + $0x18] sm:$0x1]   ;;  %v31_v6 = vld [vmem:[#allocation1 + $0x19] sm:$0x1]  }
   0xa   :  { %26 = vrot.lane.b32.xlu0 %v25_v4, %s114_s0  ;;  %38 = vrot.lane.b32.xlu1 %v37_v5, %s115_s14  ;;  %v43_v7 = vld [vmem:[#allocation1 + $0x12] sm:$0x1]   ;;  %v21_v8 = vld [vmem:[#allocation1] sm:$0x1]   ;;  %v49_v9 = vld [vmem:[#allocation1 + $0x11] sm:$0x1]  }
   0xb   :  { %23 = vst.msk [vmem:[#allocation0] sm:$0x1] %vm22_vm0, %v21_v8   ;;  %v55_v10 = vld [vmem:[#allocation1 + $0x10] sm:$0x1]   ;;  %v61_v11 = vld [vmem:[#allocation1 + $0xa] sm:$0x1]  }
   0xc   :  { %v67_v12 = vld [vmem:[#allocation1 + $0x9] sm:$0x1]   ;;  %v73_v13 = vld [vmem:[#allocation1 + $0x8] sm:$0x1]   ;;  %v79_v14 = vld [vmem:[#allocation1 + $0x2] sm:$0x1]  }
   0xd   :  { %v85_v15 = vld [vmem:[#allocation1 + $0x1] sm:$0x1]  }
   0xe   :  { %32 = vrot.lane.b32.xlu0 %v31_v6, %s116_s15  ;;  %44 = vrot.lane.b32.xlu1 %v43_v7, %s117_s16 }
  0x12   :  { %50 = vrot.lane.b32.xlu0 %v49_v9, %s118_s17  ;;  %56 = vrot.lane.b32.xlu1 %v55_v10, %s119_s18 }
  0x16   :  { %62 = vrot.lane.b32.xlu0 %v61_v11, %s120_s19  ;;  %68 = vrot.lane.b32.xlu1 %v67_v12, %s121_s20 }
  0x1a   :  { %74 = vrot.lane.b32.xlu0 %v73_v13, %s122_s21  ;;  %80 = vrot.lane.b32.xlu1 %v79_v14, %s123_s22 }
  0x1e   :  { %86 = vrot.lane.b32.xlu0 %v85_v15, %s124_s23 }
  0x7c   :  { %v27_v16 = vpop.permute.xlu0 %26   ;;  %v39_v17 = vpop.permute.xlu1 %38  }
  0x7d   :  { %29 = vst.msk [vmem:[#allocation0] sm:$0x1] %vm28_vm1, %v27_v16  }
  0x80   :  { %v33_v18 = vpop.permute.xlu0 %32   ;;  %v45_v19 = vpop.permute.xlu1 %44  }
  0x81   :  { %35 = vst.msk [vmem:[#allocation0] sm:$0x1] %vm34_vm2, %v33_v18  }
  0x82   :  { %41 = vst.msk [vmem:[#allocation0] sm:$0x1] %vm40_vm3, %v39_v17  }
  0x83   :  { %47 = vst.msk [vmem:[#allocation0] sm:$0x1] %vm46_vm4, %v45_v19  }
  0x84   :  { %v51_v20 = vpop.permute.xlu0 %50   ;;  %v57_v21 = vpop.permute.xlu1 %56  }
  0x85   :  { %53 = vst.msk [vmem:[#allocation0] sm:$0x1] %vm52_vm5, %v51_v20  }
  0x86   :  { %59 = vst.msk [vmem:[#allocation0] sm:$0x1] %vm58_vm6, %v57_v21  }
  0x88   :  { %v63_v22 = vpop.permute.xlu0 %62   ;;  %v69_v23 = vpop.permute.xlu1 %68  }
  0x89   :  { %65 = vst.msk [vmem:[#allocation0] sm:$0x1] %vm64_vm7, %v63_v22  }
  0x8a   :  { %71 = vst.msk [vmem:[#allocation0] sm:$0x1] %vm70_vm8, %v69_v23  }
  0x8c   :  { %v75_v24 = vpop.permute.xlu0 %74   ;;  %v81_v25 = vpop.permute.xlu1 %80  }
  0x8d   :  { %77 = vst.msk [vmem:[#allocation0] sm:$0x1] %vm76_vm9, %v75_v24  }
  0x8e   :  { %83 = vst.msk [vmem:[#allocation0] sm:$0x1] %vm82_vm10, %v81_v25  }
  0x90   :  { %v87_v26 = vpop.permute.xlu0 %86  }
  0x91   :  { %89 = vst.msk [vmem:[#allocation0] sm:$0x1] %vm88_vm11, %v87_v26  }
  0x98   :  { %v94_v27 = vld [vmem:[#allocation0] sm:$0x1] }
  0x99   :  { %97 = vst [vmem:[%s151_s1] sm:$0x1] %v94_v27 }

// kernel: dressed_quantum_net_forward.2
= control target key start
LH: loop header
LB: loop body
LE: loop exit
PB: predicated region body
PF: predicated region fallthrough
CT: control target
= control target key end

     0   :  { %8 = vsyncpa [#allocation3], 0  ;;  %s314_s0 = inlined_call_operand.hbm [shape: f32[1,256], index: 0, kind: input, shape index: {}]   ;;  %s315_s1 = inlined_call_operand.hbm [shape: f32[256,128], index: 1, kind: input, shape index: {}]   ;;  %s316_s2 = inlined_call_operand.hbm [shape: f32[1,128], index: 2, kind: input, shape index: {}]   ;;  %s317_s3 = inlined_call_operand.vmem [shape: f32[1,128], index: 3, kind: output, shape index: {}]  }
   0x1   :  { %9 = vsyncpa [#allocation5], 0  ;;  %s277_s12 = smov [#allocation4]  }
   0x2   :  { %s25_s13 = sshll.u32 %s277_s12, 4  ;;  %s26_s13 = int_to_ptr.vmem [resolvable:$true] %s25_s13 }
   0x3   :  { %s221_s14 = scalar_lea.vmem %s26_s13, 4096  ;;  %p226_p1 = scmp.lt.s32.totalorder %s26_s13, %s26_s13 }
   0x4   :  { %p222_p0 = scmp.ne.s32.totalorder %s26_s13, %s221_s14  ;;  %p227_p2 = scmp.lt.s32.totalorder %s221_s14, %s221_s14 }
   0x6   :  { %p228_p3 = por %p227_p2, %p226_p1 }
   0x8   :  { %p229_p4 = pnand %p228_p3, %p222_p0 }
   0xa   :  { %232 = shalt.err (!%p229_p4)
}
   0xb   :  { %s278_s15 = smov 128   ;;  %s279_s16 = smov 8  }
   0xc   :  { %31 = dma.hbm_to_vmem [thread:$0]  %s315_s1, 4096, %s26_s13, [#allocation5], %s278_s15, %s278_s15, %s279_s16  }
   0xd   :  { %s280_s19 = smov [#allocation2]   ;;  %s281_s21 = smov [#allocation6]  }
   0xe   :  { %s16_s20 = sshll.u32 %s280_s19, 4  ;;  %s38_s22 = sshll.u32 %s281_s21, 4  ;;  %s17_s20 = int_to_ptr.vmem [resolvable:$true] %s16_s20  ;;  %s39_s22 = int_to_ptr.vmem [resolvable:$true] %s38_s22 }
   0xf   :  { %s241_s23 = scalar_lea.vmem %s17_s20, 32  ;;  %p246_p6 = scmp.lt.s32.totalorder %s17_s20, %s17_s20 }
  0x10   :  { %p242_p5 = scmp.ne.s32.totalorder %s17_s20, %s241_s23  ;;  %p247_p7 = scmp.lt.s32.totalorder %s241_s23, %s241_s23 }
  0x12   :  { %p248_p8 = por %p247_p7, %p246_p6 }
  0x14   :  { %p249_p9 = pnand %p248_p8, %p242_p5 }
  0x16   :  { %252 = shalt.err (!%p249_p9)
}
  0x17   :  { %19 = dma.hbm_to_vmem [thread:$0]  %s314_s0, 32, %s17_s20, [#allocation3]  }
  0x18   :  { %s261_s26 = scalar_lea.vmem %s39_s22, 16  ;;  %s265_s1 = scalar_lea.vmem %s39_s22, 32 }
  0x19   :  { %p262_p10 = scmp.ne.s32.totalorder %s39_s22, %s261_s26  ;;  %p266_p11 = scmp.lt.s32.totalorder %s39_s22, %s39_s22 }
  0x1a   :  { %p267_p12 = scmp.lt.s32.totalorder %s265_s1, %s261_s26 }
  0x1c   :  { %p268_p13 = por %p267_p12, %p266_p11 }
  0x1e   :  { %p269_p0 = pnand %p268_p13, %p262_p10 }
  0x20   :  { %272 = shalt.err (!%p269_p0)
}
  0x21   :  { %41 = dma.hbm_to_vmem [thread:$0]  %s316_s2, 16, %s39_s22, [#allocation5]  }
  0x22   :  { %273 = dma.done.wait [#allocation3], 32  }
  0x23   :  { %274 = vsyncadd [#allocation3], 4294967264 }
  0x24   :  { %275 = dma.done.wait [#allocation5], 4112  }
  0x25   :  { %276 = vsyncadd [#allocation5], 4294963184  ;;  %v86_v0 = vlaneseq  ;;  %v83_v1 = vld [vmem:[#allocation4 + $0xf8] sm:$0xff]  ;;  %v82_v3 = vld [vmem:[#allocation4 + $0xf0] sm:$0xff] }
  0x26   :  { %v67_v2 = vld [vmem:[#allocation4 + $0x78] sm:$0xff]  ;;  %173 = vmatprep.subr.mxu0 %v83_v1  ;;  %v66_v4 = vld [vmem:[#allocation4 + $0x70] sm:$0xff]  ;;  %v81_v5 = vld [vmem:[#allocation4 + $0xe8] sm:$0xff] }
  0x27   :  { %174 = vmatpush3.msra.mxu0 %v67_v2  ;;  %v65_v6 = vld [vmem:[#allocation4 + $0x68] sm:$0xff]  ;;  %v87_v7 = vshrl.u32 %v86_v0, 7  ;;  %v80_v8 = vld [vmem:[#allocation4 + $0xe0] sm:$0xff]  ;;  %v79_v10 = vld [vmem:[#allocation4 + $0xd8] sm:$0xff] }
  0x28   :  { %175 = vmatprep.subr.mxu0 %v82_v3  ;;  %v64_v9 = vld [vmem:[#allocation4 + $0x60] sm:$0xff]  ;;  %v63_v11 = vld [vmem:[#allocation4 + $0x58] sm:$0xff]  ;;  %v78_v13 = vld [vmem:[#allocation4 + $0xd0] sm:$0xff] }
  0x29   :  { %176 = vmatpush3.msra.mxu0 %v66_v4  ;;  %v92_v12 = vsub.s32 1, %v87_v7  ;;  %v62_v14 = vld [vmem:[#allocation4 + $0x50] sm:$0xff]  ;;  %v77_v15 = vld [vmem:[#allocation4 + $0xc8] sm:$0xff]  ;;  %v51_v16 = vld [vmem:[#allocation2] sm:$0x3]  ;;  %v88_v33 = vsub.s32 0, %v87_v7 }
  0x2a   :  { %177 = vmatprep.subr.mxu0 %v81_v5  ;;  %v61_v17 = vld [vmem:[#allocation4 + $0x48] sm:$0xff]  ;;  %v76_v19 = vld [vmem:[#allocation4 + $0xc0] sm:$0xff]  ;;  %v75_v21 = vld [vmem:[#allocation4 + $0xb8] sm:$0xff] }
  0x2b   :  { %178 = vmatpush3.msra.mxu0 %v65_v6  ;;  %v93_v18 = vrot.slane %v51_v16, %v92_v12  ;;  %v60_v20 = vld [vmem:[#allocation4 + $0x40] sm:$0xff]  ;;  %v59_v22 = vld [vmem:[#allocation4 + $0x38] sm:$0xff]  ;;  %v74_v23 = vld [vmem:[#allocation4 + $0xb0] sm:$0xff]  ;;  %v89_v38 = vrot.slane %v51_v16, %v88_v33 }
  0x2c   :  { %179 = vmatprep.subr.mxu0 %v80_v8  ;;  %v58_v24 = vld [vmem:[#allocation4 + $0x30] sm:$0xff]  ;;  %v73_v25 = vld [vmem:[#allocation4 + $0xa8] sm:$0xff]  ;;  %v72_v27 = vld [vmem:[#allocation4 + $0xa0] sm:$0xff] }
  0x2d   :  { %180 = vmatpush3.msra.mxu0 %v64_v9  ;;  %160 = vmatprep.mubr.f32.mxu0 %v93_v18  ;;  %v57_v26 = vld [vmem:[#allocation4 + $0x28] sm:$0xff]  ;;  %v56_v28 = vld [vmem:[#allocation4 + $0x20] sm:$0xff]  ;;  %v71_v29 = vld [vmem:[#allocation4 + $0x98] sm:$0xff] }
  0x2e   :  { %181 = vmatprep.subr.mxu0 %v79_v10  ;;  %v55_v30 = vld [vmem:[#allocation4 + $0x18] sm:$0xff]  ;;  %v70_v31 = vld [vmem:[#allocation4 + $0x90] sm:$0xff]  ;;  %v69_v34 = vld [vmem:[#allocation4 + $0x88] sm:$0xff] }
  0x2f   :  { %182 = vmatpush3.msra.mxu0 %v63_v11  ;;  %v54_v32 = vld [vmem:[#allocation4 + $0x10] sm:$0xff]  ;;  %v53_v35 = vld [vmem:[#allocation4 + $0x8] sm:$0xff]  ;;  %v68_v36 = vld [vmem:[#allocation4 + $0x80] sm:$0xff] }
  0x30   :  { %183 = vmatprep.subr.mxu0 %v78_v13  ;;  %v52_v37 = vld [vmem:[#allocation4] sm:$0xff] }
  0x31   :  { %184 = vmatpush3.msra.mxu0 %v62_v14  ;;  %v84_v40 = vld [vmem:[#allocation6] sm:$0x1] }
  0x32   :  { %185 = vmatprep.subr.mxu0 %v77_v15 }
  0x33   :  { %186 = vmatpush3.msra.mxu0 %v61_v17 }
  0x34   :  { %187 = vmatprep.subr.mxu0 %v76_v19 }
  0x35   :  { %188 = vmatpush3.msra.mxu0 %v60_v20 }
  0x36   :  { %189 = vmatprep.subr.mxu0 %v75_v21 }
  0x37   :  { %190 = vmatpush3.msra.mxu0 %v59_v22 }
  0x38   :  { %191 = vmatprep.subr.mxu0 %v74_v23 }
  0x39   :  { %192 = vmatpush3.msra.mxu0 %v58_v24 }
  0x3a   :  { %193 = vmatprep.subr.mxu0 %v73_v25 }
  0x3b   :  { %194 = vmatpush3.msra.mxu0 %v57_v26 }
  0x3c   :  { %195 = vmatprep.subr.mxu0 %v72_v27 }
  0x3d   :  { %196 = vmatpush3.msra.mxu0 %v56_v28 }
  0x3e   :  { %197 = vmatprep.subr.mxu0 %v71_v29 }
  0x3f   :  { %198 = vmatpush3.msra.mxu0 %v55_v30 }
  0x40   :  { %199 = vmatprep.subr.mxu0 %v70_v31 }
  0x41   :  { %200 = vmatpush3.msra.mxu0 %v54_v32 }
  0x42   :  { %201 = vmatprep.subr.mxu0 %v69_v34 }
  0x43   :  { %202 = vmatpush3.msra.mxu0 %v53_v35 }
  0x44   :  { %203 = vmatprep.subr.mxu0 %v68_v36 }
  0x45   :  { %204 = vmatpush3.msra.mxu0 %v52_v37 }
  0x46   :  { %161 = vmatmul.mubr.f32.vlgmr.msra.gmra.mxu0 %v89_v38 }
 0x106   :  { %v205_v39 = vpop.f32.mrf.mxu0 }
 0x108   :  { %v206_v41 = vpop.f32.mrf.mxu0 }
 0x109   :  { %v207_v42 = vadd.f32 %v206_v41, %v205_v39 }
 0x10b   :  { %v163_v43 = vadd.f32 %v207_v42, %v84_v40 }
 0x10d   :  { %166 = vst [vmem:[%s317_s3] sm:$0x1] %v163_v43 }
 0x10e   :  { %171 = vsyncpa [#allocation3], 1 }
 0x10f   :  { %172 = vsyncpa [#allocation5], 1 }

// kernel: squeeze.17
= control target key start
LH: loop header
LB: loop body
LE: loop exit
PB: predicated region body
PF: predicated region fallthrough
CT: control target
= control target key end

     0   :  { %s77_s0 = inlined_call_operand.vmem [shape: f32[16], index: 0, kind: input, shape index: {}]   ;;  %s78_s1 = inlined_call_operand.hbm [shape: f32[1,2,8], index: 1, kind: output, shape index: {}]  }
   0x1   :  { %v6_v0 = vld [vmem:[%s77_s0] sm:$0x1] }
   0x2   :  { %2 = vsyncpa [#allocation1], 0  ;;  %7 = vst [vmem:[#allocation3] sm:$0x1] %v6_v0  ;;  %vm9_vm0 = vcmask 64512   ;;  %s59_s0 = smov 120  }
   0x3   :  { %s60_s8 = smov [#allocation0]  }
   0x4   :  { %s29_s9 = sshll.u32 %s60_s8, 4  ;;  %s30_s9 = int_to_ptr.vmem [resolvable:$true] %s29_s9 }
   0x5   :  { %s37_s10 = scalar_lea.vmem %s30_s9, 32  ;;  %p42_p1 = scmp.lt.s32.totalorder %s30_s9, %s30_s9 }
   0x6   :  { %p38_p0 = scmp.ne.s32.totalorder %s30_s9, %s37_s10  ;;  %p43_p2 = scmp.lt.s32.totalorder %s37_s10, %s37_s10 }
   0x8   :  { %p44_p3 = por %p43_p2, %p42_p1 }
   0x9   :  { %v11_v1 = vld [vmem:[#allocation3] sm:$0x1]  }
   0xa   :  { %v8_v2 = vld [vmem:[#allocation3] sm:$0x1]   ;;  %12 = vrot.lane.b32.xlu0 %v11_v1, %s59_s0  ;;  %p45_p4 = pnand %p44_p3, %p38_p0 }
   0xb   :  { %10 = vst.msk [vmem:[#allocation2] sm:$0x1] %vm9_vm0, %v8_v2  }
  0x7c   :  { %v13_v3 = vpop.permute.xlu0 %12  }
  0x7d   :  { %16 = vst.msk [vmem:[#allocation2 + $0x1] sm:$0x1] %vm9_vm0, %v13_v3  }
  0x84   :  { %v21_v4 = vld [vmem:[#allocation2] sm:$0x3] }
  0x85   :  { %24 = vst [vmem:[#allocation0] sm:$0x3] %v21_v4 }
  0x86   :  { %48 = shalt.err (!%p45_p4)
}
  0x87   :  { %32 = dma.vmem_to_hbm [thread:$0]  %s30_s9, 32, %s78_s1, [#allocation1]  }
  0x88   :  { %57 = dma.done.wait [#allocation1], 32  }
  0x89   :  { %58 = vsyncadd [#allocation1], 4294967264 }
  0x8a   :  { %34 = vsyncpa [#allocation1], 1 }

// kernel: dressed_quantum_net_forward.3
= control target key start
LH: loop header
LB: loop body
LE: loop exit
PB: predicated region body
PF: predicated region fallthrough
CT: control target
= control target key end

     0   :  { %vm23_vm0 = vcmask 261120   ;;  %v672_v16 = vmov 0.0   ;;  %vm673_vm1 = vmmov 0   ;;  %s788_s1 = inlined_call_operand.vmem [shape: f32[4,32,32], index: 1, kind: input, shape index: {}]   ;;  %s789_s0 = inlined_call_operand.vmem [shape: f32[1,32], index: 0, kind: input, shape index: {}]   ;;  %s790_s2 = inlined_call_operand.vmem [shape: f32[2,32,128], index: 2, kind: input, shape index: {}]   ;;  %s791_s3 = inlined_call_operand.vmem [shape: f32[1,128], index: 3, kind: output, shape index: {}]  }
   0x1   :  { %v537_v0 = vld [vmem:[%s788_s1 + $0x38] sm:$0xff]  ;;  %v536_v2 = vld [vmem:[%s788_s1 + $0x30] sm:$0xff]  ;;  %v535_v4 = vld [vmem:[%s788_s1 + $0x28] sm:$0xff] }
   0x2   :  { %v549_v1 = vld [vmem:[%s788_s1 + $0x78] sm:$0xff]  ;;  %598 = vmatprep.subr.mxu0 %v537_v0  ;;  %v548_v3 = vld [vmem:[%s788_s1 + $0x70] sm:$0xff]  ;;  %v547_v5 = vld [vmem:[%s788_s1 + $0x68] sm:$0xff] }
   0x3   :  { %612 = vmatprep.subr.mxu1 %v549_v1  ;;  %599 = vmatpush3.msra.mxu0 %v537_v0  ;;  %v534_v6 = vld [vmem:[%s788_s1 + $0x20] sm:$0xff]  ;;  %v15_v10 = vld [vmem:[%s788_s1 + $0x8] sm:$0xff]  ;;  %v16_v12 = vld [vmem:[%s788_s1 + $0x10] sm:$0xff] }
   0x4   :  { %613 = vmatpush3.msra.mxu1 %v549_v1  ;;  %600 = vmatprep.subr.mxu0 %v536_v2  ;;  %v546_v7 = vld [vmem:[%s788_s1 + $0x60] sm:$0xff]  ;;  %v543_v11 = vld [vmem:[%s788_s1 + $0x48] sm:$0xff]  ;;  %v544_v13 = vld [vmem:[%s788_s1 + $0x50] sm:$0xff] }
   0x5   :  { %614 = vmatprep.subr.mxu1 %v548_v3  ;;  %601 = vmatpush3.msra.mxu0 %v536_v2  ;;  %v14_v8 = vld [vmem:[%s788_s1] sm:$0xff]  ;;  %v17_v14 = vld [vmem:[%s788_s1 + $0x18] sm:$0xff]  ;;  %v558_v28 = vld [vmem:[%s790_s2 + $0x30] sm:$0xff] }
   0x6   :  { %615 = vmatpush3.msra.mxu1 %v548_v3  ;;  %602 = vmatprep.subr.mxu0 %v535_v4  ;;  %v542_v9 = vld [vmem:[%s788_s1 + $0x40] sm:$0xff]  ;;  %v545_v15 = vld [vmem:[%s788_s1 + $0x58] sm:$0xff]  ;;  %v376_v29 = vld [vmem:[%s790_s2 + $0x10] sm:$0xff] }
   0x7   :  { %616 = vmatprep.subr.mxu1 %v547_v5  ;;  %603 = vmatpush3.msra.mxu0 %v535_v4  ;;  %v228_v25 = vld [vmem:[%s789_s0] sm:$0x1]  ;;  %v559_v26 = vld [vmem:[%s790_s2 + $0x38] sm:$0xff]  ;;  %v557_v30 = vld [vmem:[%s790_s2 + $0x28] sm:$0xff] }
   0x8   :  { %617 = vmatpush3.msra.mxu1 %v547_v5  ;;  %604 = vmatprep.subr.mxu0 %v534_v6  ;;  %v377_v27 = vld [vmem:[%s790_s2 + $0x18] sm:$0xff]  ;;  %v375_v31 = vld [vmem:[%s790_s2 + $0x8] sm:$0xff]  ;;  %v556_v32 = vld [vmem:[%s790_s2 + $0x20] sm:$0xff] }
   0x9   :  { %618 = vmatprep.subr.mxu1 %v546_v7  ;;  %605 = vmatpush3.msra.mxu0 %v534_v6  ;;  %v374_v33 = vld [vmem:[%s790_s2] sm:$0xff] }
   0xa   :  { %606 = vmatprep.mubr.msk.f32.mxu0 %vm23_vm0, %v14_v8  ;;  %619 = vmatpush3.msra.mxu1 %v546_v7 }
   0xb   :  { %620 = vmatprep.mubr.msk.f32.mxu1 %vm23_vm0, %v542_v9  ;;  %607 = vmatmul.mubr.msk.f32.vlgmr.msra.gmra.mxu0 %vm23_vm0, %v15_v10 }
   0xc   :  { %621 = vmatmul.mubr.msk.f32.vlgmr.msra.gmra.mxu1 %vm23_vm0, %v543_v11  ;;  %609 = vmatprep.mubr.msk.f32.mxu0 %vm23_vm0, %v16_v12 }
   0xd   :  { %623 = vmatprep.mubr.msk.f32.mxu1 %vm23_vm0, %v544_v13  ;;  %626 = vmatprep.subr.mxu0 %v672_v16 }
   0xe   :  { %637 = vmatprep.subr.mxu1 %v672_v16 }
   0xf   :  { %610 = vmatmul.mubr.msk.f32.gmra.mxu0 %vm23_vm0, %v17_v14 }
  0x10   :  { %624 = vmatmul.mubr.msk.f32.gmra.mxu1 %vm23_vm0, %v545_v15  ;;  %634 = vmatprep.mubr.msk.f32.mxu0 %vm673_vm1, %v672_v16 }
  0x11   :  { %645 = vmatprep.mubr.msk.f32.mxu1 %vm673_vm1, %v672_v16 }
  0xcb   :  { %v608_v17 = vpop.f32.mrf.mxu0 }
  0xcc   :  { %v622_v18 = vpop.f32.mrf.mxu1 }
  0xcd   :  { %v102_v19 = vpop.f32.mrf.mxu0 }
  0xce   :  { %v209_v20 = vpop.f32.mrf.mxu1 }
  0xcf   :  { %v611_v21 = vpop.f32.mrf.mxu0 }
  0xd0   :  { %v625_v22 = vpop.f32.mrf.mxu1  ;;  %627 = vmatpush3.msra.mxu0 %v611_v21 }
  0xd1   :  { %638 = vmatpush3.msra.mxu1 %v625_v22  ;;  %v112_v23 = vpop.f32.mrf.mxu0  ;;  %628 = vmatprep.subr.mxu0 %v672_v16 }
  0xd2   :  { %v219_v24 = vpop.f32.mrf.mxu1  ;;  %639 = vmatprep.subr.mxu1 %v672_v16  ;;  %629 = vmatpush3.msra.mxu0 %v112_v23 }
  0xd3   :  { %640 = vmatpush3.msra.mxu1 %v219_v24  ;;  %630 = vmatprep.subr.mxu0 %v672_v16 }
  0xd4   :  { %641 = vmatprep.subr.mxu1 %v672_v16  ;;  %631 = vmatpush3.msra.mxu0 %v608_v17 }
  0xd5   :  { %642 = vmatpush3.msra.mxu1 %v622_v18  ;;  %632 = vmatprep.subr.mxu0 %v672_v16 }
  0xd6   :  { %643 = vmatprep.subr.mxu1 %v672_v16  ;;  %633 = vmatpush3.msra.mxu0 %v102_v19 }
  0xd7   :  { %644 = vmatpush3.msra.mxu1 %v209_v20  ;;  %635 = vmatmul.mubr.msk.f32.vlgmr.msra.gmra.mxu0 %vm23_vm0, %v228_v25 }
  0xd8   :  { %646 = vmatmul.mubr.msk.f32.vlgmr.msra.gmra.mxu1 %vm23_vm0, %v228_v25  ;;  %648 = vmatprep.subr.mxu0 %v672_v16 }
  0xd9   :  { %659 = vmatprep.subr.mxu1 %v672_v16  ;;  %649 = vmatpush3.msra.mxu0 %v559_v26 }
  0xda   :  { %660 = vmatpush3.msra.mxu1 %v377_v27  ;;  %650 = vmatprep.subr.mxu0 %v672_v16 }
  0xdb   :  { %661 = vmatprep.subr.mxu1 %v672_v16  ;;  %651 = vmatpush3.msra.mxu0 %v558_v28 }
  0xdc   :  { %662 = vmatpush3.msra.mxu1 %v376_v29  ;;  %652 = vmatprep.subr.mxu0 %v672_v16 }
  0xdd   :  { %663 = vmatprep.subr.mxu1 %v672_v16  ;;  %656 = vmatprep.mubr.msk.f32.mxu0 %vm673_vm1, %v672_v16 }
  0xde   :  { %667 = vmatprep.mubr.msk.f32.mxu1 %vm673_vm1, %v672_v16  ;;  %653 = vmatpush3.msra.mxu0 %v557_v30 }
  0xdf   :  { %664 = vmatpush3.msra.mxu1 %v375_v31  ;;  %654 = vmatprep.subr.mxu0 %v672_v16 }
  0xe0   :  { %665 = vmatprep.subr.mxu1 %v672_v16  ;;  %655 = vmatpush3.msra.mxu0 %v556_v32 }
  0xe1   :  { %666 = vmatpush3.msra.mxu1 %v374_v33 }
 0x197   :  { %v298_v34 = vpop.f32.mrf.mxu0 }
 0x198   :  { %v368_v35 = vpop.f32.mrf.mxu1  ;;  %v372_v36 = vmul.f32 %v298_v34, %v298_v34 }
 0x199   :  { %v373_v37 = vmul.f32 %v368_v35, %v368_v35  ;;  %v636_v38 = vpop.f32.mrf.mxu0 }
 0x19a   :  { %v647_v39 = vpop.f32.mrf.mxu1  ;;  %668 = vmatmul.mubr.msk.f32.vlgmr.msra.gmra.mxu1 %vm23_vm0, %v372_v36 }
 0x19b   :  { %657 = vmatmul.mubr.msk.f32.vlgmr.msra.gmra.mxu0 %vm23_vm0, %v373_v37 }
 0x25a   :  { %v525_v41 = vpop.f32.mrf.mxu1 }
 0x25b   :  { %v452_v40 = vpop.f32.mrf.mxu0 }
 0x25c   :  { %v526_v42 = vadd.f32 %v525_v41, %v452_v40  ;;  %v669_v44 = vpop.f32.mrf.mxu1 }
 0x25d   :  { %v658_v43 = vpop.f32.mrf.mxu0 }
 0x25e   :  { %529 = vst [vmem:[%s791_s3] sm:$0x1] %v526_v42 }

</bundles_post_ra>
